<compile_context>
chip_gen: v7x
topology: tpu7x:2x2x1
jax: 0.10.0
libtpu: 0.0.40
codegen_flags: <defaults>
</compile_context>

<pallas_src>
import functools

import jax
import jax.numpy as jnp
from jax.experimental import pallas as pl
from jax.experimental.pallas import tpu as pltpu

LN_EPS = 1e-5


def _ln_relu(h, gamma, beta):
    """Two-pass LayerNorm (f32, biased variance, eps inside rsqrt) + affine + ReLU."""
    mu = jnp.mean(h, axis=-1, keepdims=True)
    c = h - mu
    var = jnp.mean(c * c, axis=-1, keepdims=True)
    hn = c * jax.lax.rsqrt(var + LN_EPS)
    return jnp.maximum(hn * gamma + beta, 0.0)


def droq_critic_kernel(obs_ref, act_ref, w1_ref, w2_ref, w3_ref, vec_ref, out_ref):
    """One (ensemble-member e, batch-tile i) grid step of the fused DROQ critic MLP."""
    wdt = w1_ref.dtype                     # matmuls run in the weights' dtype (bf16/f32)
    C = out_ref.shape[-1]
    vec = vec_ref[...]                     # (8, H) f32: b1,g1,beta1,b2,g2,beta2,b3|0,unused

    # Fused torch.cat: in-VMEM lane concat (Do+Da lanes fit in one vreg) -> single dot.
    x = jnp.concatenate([obs_ref[...], act_ref[...]], axis=-1)

    # Layer 1: Linear -> LayerNorm -> ReLU
    h = jnp.dot(x, w1_ref[...], preferred_element_type=jnp.float32) + vec[0:1, :]
    h = _ln_relu(h, vec[1:2, :], vec[2:3, :])

    # Layer 2: Linear -> LayerNorm -> ReLU
    h = jnp.dot(h.astype(wdt), w2_ref[...], preferred_element_type=jnp.float32) + vec[3:4, :]
    h = _ln_relu(h, vec[4:5, :], vec[5:6, :])

    # Output head: Linear (num_critics outputs)
    q = jnp.dot(h.astype(wdt), w3_ref[...], preferred_element_type=jnp.float32) + vec[6:7, :C]
    out_ref[...] = q.astype(out_ref.dtype)


def _round_up(x, m):
    return ((x + m - 1) // m) * m


def _cdiv(a, b):
    return -(-a // b)


def _pick_batch_tile(batch, align, cap=2048):
    """Batch tile: one tile for small batches, else balanced tiles of at most `cap` rows.

    Only sublane alignment is required on the batch axis (8 rows f32, 16 rows bf16);
    large tiles amortize the ~0.35 us per-grid-step overhead.
    """
    cap = max(_round_up(cap, align), align)
    if batch <= cap:
        return _round_up(batch, align)
    n_tiles = _cdiv(batch, cap)
    return _round_up(_cdiv(batch, n_tiles), align)


def _vmem_estimate(tb, din, hidden, c, w_itm, in_itm):
    """Static double-buffered worst-case VMEM footprint (bytes)."""
    weight_bytes = (din * hidden + hidden * hidden + hidden * c) * w_itm
    vec_bytes = 8 * hidden * 4
    tile_bytes = tb * din * in_itm + tb * c * 4
    act_bytes = 6 * tb * hidden * 4                      # f32 intermediates headroom
    return 2 * (weight_bytes + vec_bytes + tile_bytes) + act_bytes + (4 << 20)


def _vmem_budget():
    """Physical VMEM capacity (64 MiB v7x / 128 MiB v5e-v6e) minus scheduler headroom."""
    try:
        cap = int(pltpu.get_tpu_info().vmem_capacity_bytes)
    except Exception:  # pragma: no cover - conservative fallback (v7x-sized)
        cap = 64 << 20
    return max(cap - (16 << 20), 16 << 20)


@functools.partial(jax.jit, static_argnames=("block_b",))
def droq_critic_ensemble_forward(obs, action, params, *, block_b=None):
    """Fused forward for a stack of E DROQ critics in one pallas_call.

    obs:    (B, obs_dim) float32
    action: (B, act_dim) float32
    params: pytree with a leading ensemble axis E on every leaf (see init_ensemble_params).
    Returns (E, B, num_critics) float32.
    """
    B, Do = obs.shape
    Da = action.shape[1]
    E, Din, H = params["w1"].shape
    C = params["w3"].shape[2]
    assert Din == Do + Da, "w1 must act on concat([obs, action], -1)"

    wdt = params["w1"].dtype
    w_itm = jnp.dtype(wdt).itemsize
    align = max(8, 32 // w_itm)            # sublane packing: 8 rows (f32), 16 rows (bf16)

    budget = _vmem_budget()
    if block_b is None:
        tb = _pick_batch_tile(B, align)
        while tb > align and _vmem_estimate(tb, Din, H, C, w_itm, w_itm) > budget:
            tb = max(align, _round_up(tb // 2, align))
    else:
        tb = block_b
    assert tb % align == 0, "batch tile must respect sublane packing (8 f32 / 16 bf16)"

    # Stream activations in the weights' dtype (halves DMA bytes for bf16 weights).
    obs = obs.astype(wdt)
    action = action.astype(wdt)

    # Ragged batches: zero-pad rows up to a tile multiple (LayerNorm of a constant row
    # stays finite because eps > 0) and slice the result afterwards.
    b_pad = _round_up(B, tb)
    if b_pad != B:
        obs = jnp.pad(obs, ((0, b_pad - B), (0, 0)))
        action = jnp.pad(action, ((0, b_pad - B), (0, 0)))
    nb = b_pad // tb

    est = _vmem_estimate(tb, Din, H, C, w_itm, w_itm)
    vmem_limit = int(min(max(est, 32 << 20), budget))

    def resident(shape2d):
        # Per-ensemble-member block; constant across the inner batch axis, so it is
        # DMA'd once per ensemble member and stays resident in VMEM.
        return pl.BlockSpec((None,) + tuple(shape2d), lambda e, i: (e, 0, 0))

    out = pl.pallas_call(
        droq_critic_kernel,
        out_shape=jax.ShapeDtypeStruct((E, b_pad, C), jnp.float32),
        grid=(E, nb),
        in_specs=[
            pl.BlockSpec((tb, Do), lambda e, i: (i, 0)),   # obs batch tile
            pl.BlockSpec((tb, Da), lambda e, i: (i, 0)),   # action batch tile
            resident((Din, H)),                            # W1 (acts on concat input)
            resident((H, H)),                              # W2
            resident((H, C)),                              # W3
            resident((8, H)),                              # packed b/gamma/beta slab
        ],
        out_specs=pl.BlockSpec((None, tb, C), lambda e, i: (e, i, 0)),
        compiler_params=pltpu.CompilerParams(
            # E leads so v7x megacore shards on the ensemble axis (weights stay per-core
            # resident); on single-TC v5e/v6e the semantics choice is ~neutral.
            dimension_semantics=("parallel", "parallel"),
            vmem_limit_bytes=vmem_limit,
        ),
    )(obs, action, params["w1"], params["w2"], params["w3"], params["vec"])
    return out[:, :B] if b_pad != B else out


@functools.partial(jax.jit, static_argnames=("block_b",))
def droq_critic_forward(obs, action, params, *, block_b=None):
    """Single-critic forward matching DROQCritic.forward: returns (B, num_critics)."""
    stacked = jax.tree_util.tree_map(lambda x: x[None], params)
    return droq_critic_ensemble_forward(obs, action, stacked, block_b=block_b)[0]


def init_critic_params(key, obs_dim, act_dim, hidden_size=256, num_critics=1,
                       weight_dtype=jnp.bfloat16):
    """Synthetic parameters matching DROQCritic shapes.

    To import from PyTorch: nn.Linear stores weight as (out, in) -> transpose to (in, out)
    here; the layer-1 weight acts on concat([obs, action], -1).  Biases and LayerNorm
    affine params are packed row-wise into a single (8, H) f32 slab:
      row 0: b1, 1: gamma1, 2: beta1, 3: b2, 4: gamma2, 5: beta2,
      row 6: b3 zero-padded to H, row 7: unused.
    Matmul weights may be bf16 (default); LayerNorm math stays f32 in the kernel.
    """
    D, H, C = obs_dim + act_dim, hidden_size, num_critics
    assert C <= H, "num_critics must not exceed hidden_size (b3 is packed into the vec slab)"
    ks = jax.random.split(key, 6)
    s1 = 1.0 / jnp.sqrt(D)
    s2 = 1.0 / jnp.sqrt(H)
    u = jax.random.uniform
    vec = jnp.zeros((8, H), jnp.float32)
    vec = vec.at[0].set(u(ks[1], (H,), jnp.float32, -s1, s1))       # b1
    vec = vec.at[1].set(jnp.ones((H,), jnp.float32))                # gamma1
    vec = vec.at[3].set(u(ks[3], (H,), jnp.float32, -s2, s2))       # b2
    vec = vec.at[4].set(jnp.ones((H,), jnp.float32))                # gamma2
    vec = vec.at[6, :C].set(u(ks[5], (C,), jnp.float32, -s2, s2))   # b3 (padded to H)
    return {
        "w1": u(ks[0], (D, H), jnp.float32, -s1, s1).astype(weight_dtype),
        "w2": u(ks[2], (H, H), jnp.float32, -s2, s2).astype(weight_dtype),
        "w3": u(ks[4], (H, C), jnp.float32, -s2, s2).astype(weight_dtype),
        "vec": vec,
    }


def init_ensemble_params(key, num_q, obs_dim, act_dim, hidden_size=256, num_critics=1,
                         weight_dtype=jnp.bfloat16):
    keys = jax.random.split(key, num_q)
    per = [init_critic_params(k, obs_dim, act_dim, hidden_size, num_critics, weight_dtype)
           for k in keys]
    return jax.tree_util.tree_map(lambda *xs: jnp.stack(xs, axis=0), *per)


def _reference(obs, action, params):
    """Pure-JAX reference replicating PyTorch DROQCritic semantics (vmapped over E)."""
    def ln(h, g, b):
        mu = jnp.mean(h, axis=-1, keepdims=True)
        var = jnp.mean((h - mu) ** 2, axis=-1, keepdims=True)
        return (h - mu) * jax.lax.rsqrt(var + LN_EPS) * g + b

    def one(p):
        wdt = p["w1"].dtype
        C = p["w3"].shape[-1]
        vec = p["vec"]
        x = jnp.concatenate([obs, action], axis=-1).astype(wdt)
        h = jnp.dot(x, p["w1"], preferred_element_type=jnp.float32) + vec[0:1]
        h = jnp.maximum(ln(h, vec[1:2], vec[2:3]), 0.0)
        h = jnp.dot(h.astype(wdt), p["w2"], preferred_element_type=jnp.float32) + vec[3:4]
        h = jnp.maximum(ln(h, vec[4:5], vec[5:6]), 0.0)
        return jnp.dot(h.astype(wdt), p["w3"], preferred_element_type=jnp.float32) + vec[6:7, :C]

    return jax.vmap(one)(params)


if __name__ == "__main__":
    key = jax.random.PRNGKey(0)
    k_obs, k_act, k_par = jax.random.split(key, 3)

    B, obs_dim, act_dim = 8, 16, 8
    hidden_size, num_critics, num_q = 128, 2, 2

    obs = jax.random.normal(k_obs, (B, obs_dim), jnp.float32)
    action = jax.random.normal(k_act, (B, act_dim), jnp.float32)

    # 1) f32 weights: tight check against the PyTorch-equivalent reference.
    params32 = init_ensemble_params(k_par, num_q, obs_dim, act_dim,
                                    hidden_size, num_critics, jnp.float32)
    q32 = jax.block_until_ready(droq_critic_ensemble_forward(obs, action, params32))
    ref32 = _reference(obs, action, params32)
    assert q32.shape == (num_q, B, num_critics)
    assert jnp.allclose(q32, ref32, atol=1e-4, rtol=1e-4), "f32 mismatch vs reference"

    # 2) Default bf16 weights (half DMA bytes, native bf16 MXU path); LayerNorm stays f32.
    params16 = init_ensemble_params(k_par, num_q, obs_dim, act_dim,
                                    hidden_size, num_critics)
    q16 = jax.block_until_ready(droq_critic_ensemble_forward(obs, action, params16))
    ref16 = _reference(obs, action, params16)
    assert jnp.allclose(q16, ref16, atol=3e-2, rtol=3e-2), "bf16 mismatch vs reference"

    # 3) Ragged batch: padded internally, sliced back.
    B_ragged = 5
    q_rag = jax.block_until_ready(
        droq_critic_ensemble_forward(obs[:B_ragged], action[:B_ragged], params32))
    assert q_rag.shape == (num_q, B_ragged, num_critics)
    assert jnp.allclose(q_rag, ref32[:, :B_ragged], atol=1e-4, rtol=1e-4), "ragged mismatch"

    # 4) Single-critic convenience path matching DROQCritic.forward exactly.
    single = jax.tree_util.tree_map(lambda x: x[0], params32)
    q_single = jax.block_until_ready(droq_critic_forward(obs, action, single))
    assert q_single.shape == (B, num_critics)
    assert jnp.allclose(q_single, q32[0], atol=1e-5, rtol=1e-5), "single-critic mismatch"

    print("KERNEL_OK")
</pallas_src>

<mosaic_0001>
module attributes {stable_mosaic.version = 11 : i64} {
  func.func @droq_critic_kernel(%arg0: i32, %arg1: i32, %arg2: memref<8x16xf32, #tpu.memory_space<vmem>>, %arg3: memref<8x8xf32, #tpu.memory_space<vmem>>, %arg4: memref<1x24x128xf32, #tpu.memory_space<vmem>>, %arg5: memref<1x128x128xf32, #tpu.memory_space<vmem>>, %arg6: memref<1x128x2xf32, #tpu.memory_space<vmem>>, %arg7: memref<1x8x128xf32, #tpu.memory_space<vmem>>, %arg8: memref<1x8x2xf32, #tpu.memory_space<vmem>>) attributes {dimension_semantics = [#tpu.dimension_semantics<parallel>, #tpu.dimension_semantics<parallel>], iteration_bounds = array<i64: 2, 1>, scalar_prefetch = 0 : i64, scratch_operands = 0 : i64, tpu.core_type = #tpu.core_type<tc>, window_params = [{transform_indices = @transform_0, window_bounds = array<i64: 8, 16>}, {transform_indices = @transform_1, window_bounds = array<i64: 8, 8>}, {transform_indices = @transform_2, window_bounds = array<i64: 1, 24, 128>}, {transform_indices = @transform_3, window_bounds = array<i64: 1, 128, 128>}, {transform_indices = @transform_4, window_bounds = array<i64: 1, 128, 2>}, {transform_indices = @transform_5, window_bounds = array<i64: 1, 8, 128>}, {transform_indices = @transform_6, window_bounds = array<i64: 1, 8, 2>}]} {
    %c0 = arith.constant 0 : index
    %c0_0 = arith.constant 0 : index
    %c0_1 = arith.constant 0 : index
    %0 = vector.load %arg7[%c0, %c0_0, %c0_1] : memref<1x8x128xf32, #tpu.memory_space<vmem>>, vector<1x8x128xf32>
    %1 = vector.shape_cast %0 : vector<1x8x128xf32> to vector<8x128xf32>
    %c0_2 = arith.constant 0 : index
    %c0_3 = arith.constant 0 : index
    %2 = vector.load %arg2[%c0_2, %c0_3] : memref<8x16xf32, #tpu.memory_space<vmem>>, vector<8x16xf32>
    %c0_4 = arith.constant 0 : index
    %c0_5 = arith.constant 0 : index
    %3 = vector.load %arg3[%c0_4, %c0_5] : memref<8x8xf32, #tpu.memory_space<vmem>>, vector<8x8xf32>
    %4 = tpu.concatenate %2, %3 in 1 : vector<8x16xf32>, vector<8x8xf32> -> vector<8x24xf32>
    %c0_6 = arith.constant 0 : index
    %c0_7 = arith.constant 0 : index
    %c0_8 = arith.constant 0 : index
    %5 = vector.load %arg4[%c0_6, %c0_7, %c0_8] : memref<1x24x128xf32, #tpu.memory_space<vmem>>, vector<1x24x128xf32>
    %6 = vector.shape_cast %5 : vector<1x24x128xf32> to vector<24x128xf32>
    %cst = arith.constant dense<0.000000e+00> : vector<8x128xf32>
    %7 = tpu.matmul %4, %6, %cst {dimension_numbers = #tpu.dot_dimension_numbers<[1], [0], [0], [1], [0, 0, 1, 1], [], []>} : vector<8x24xf32>, vector<24x128xf32>, vector<8x128xf32> -> vector<8x128xf32>
    %8 = vector.extract_strided_slice %1 {offsets = [0, 0], sizes = [1, 128], strides = [1, 1]} : vector<8x128xf32> to vector<1x128xf32>
    %9 = vector.broadcast %8 : vector<1x128xf32> to vector<8x128xf32>
    %10 = arith.addf %7, %9 : vector<8x128xf32>
    %11 = vector.extract_strided_slice %1 {offsets = [1, 0], sizes = [1, 128], strides = [1, 1]} : vector<8x128xf32> to vector<1x128xf32>
    %12 = vector.extract_strided_slice %1 {offsets = [2, 0], sizes = [1, 128], strides = [1, 1]} : vector<8x128xf32> to vector<1x128xf32>
    %cst_9 = arith.constant dense<0.000000e+00> : vector<8xf32>
    %13 = vector.multi_reduction <add>, %10, %cst_9 [1] : vector<8x128xf32> to vector<8xf32>
    %14 = vector.shape_cast %13 : vector<8xf32> to vector<8x1xf32>
    %cst_10 = arith.constant 1.280000e+02 : f32
    %15 = vector.broadcast %cst_10 : f32 to vector<8x1xf32>
    %16 = arith.divf %14, %15 : vector<8x1xf32>
    %17 = vector.broadcast %16 : vector<8x1xf32> to vector<8x128xf32>
    %18 = arith.subf %10, %17 : vector<8x128xf32>
    %19 = arith.mulf %18, %18 : vector<8x128xf32>
    %cst_11 = arith.constant dense<0.000000e+00> : vector<8xf32>
    %20 = vector.multi_reduction <add>, %19, %cst_11 [1] : vector<8x128xf32> to vector<8xf32>
    %21 = vector.shape_cast %20 : vector<8xf32> to vector<8x1xf32>
    %cst_12 = arith.constant 1.280000e+02 : f32
    %22 = vector.broadcast %cst_12 : f32 to vector<8x1xf32>
    %23 = arith.divf %21, %22 : vector<8x1xf32>
    %cst_13 = arith.constant 9.99999974E-6 : f32
    %24 = vector.broadcast %cst_13 : f32 to vector<8x1xf32>
    %25 = arith.addf %23, %24 : vector<8x1xf32>
    %26 = math.rsqrt %25 : vector<8x1xf32>
    %27 = vector.broadcast %26 : vector<8x1xf32> to vector<8x128xf32>
    %28 = arith.mulf %18, %27 : vector<8x128xf32>
    %29 = vector.broadcast %11 : vector<1x128xf32> to vector<8x128xf32>
    %30 = arith.mulf %28, %29 : vector<8x128xf32>
    %31 = vector.broadcast %12 : vector<1x128xf32> to vector<8x128xf32>
    %32 = arith.addf %30, %31 : vector<8x128xf32>
    %cst_14 = arith.constant 0.000000e+00 : f32
    %33 = vector.broadcast %cst_14 : f32 to vector<8x128xf32>
    %34 = arith.maximumf %32, %33 : vector<8x128xf32>
    %c0_15 = arith.constant 0 : index
    %c0_16 = arith.constant 0 : index
    %c0_17 = arith.constant 0 : index
    %35 = vector.load %arg5[%c0_15, %c0_16, %c0_17] : memref<1x128x128xf32, #tpu.memory_space<vmem>>, vector<1x128x128xf32>
    %36 = vector.shape_cast %35 : vector<1x128x128xf32> to vector<128x128xf32>
    %cst_18 = arith.constant dense<0.000000e+00> : vector<8x128xf32>
    %37 = tpu.matmul %34, %36, %cst_18 {dimension_numbers = #tpu.dot_dimension_numbers<[1], [0], [0], [1], [0, 0, 1, 1], [], []>} : vector<8x128xf32>, vector<128x128xf32>, vector<8x128xf32> -> vector<8x128xf32>
    %38 = vector.extract_strided_slice %1 {offsets = [3, 0], sizes = [1, 128], strides = [1, 1]} : vector<8x128xf32> to vector<1x128xf32>
    %39 = vector.broadcast %38 : vector<1x128xf32> to vector<8x128xf32>
    %40 = arith.addf %37, %39 : vector<8x128xf32>
    %41 = vector.extract_strided_slice %1 {offsets = [4, 0], sizes = [1, 128], strides = [1, 1]} : vector<8x128xf32> to vector<1x128xf32>
    %42 = vector.extract_strided_slice %1 {offsets = [5, 0], sizes = [1, 128], strides = [1, 1]} : vector<8x128xf32> to vector<1x128xf32>
    %cst_19 = arith.constant dense<0.000000e+00> : vector<8xf32>
    %43 = vector.multi_reduction <add>, %40, %cst_19 [1] : vector<8x128xf32> to vector<8xf32>
    %44 = vector.shape_cast %43 : vector<8xf32> to vector<8x1xf32>
    %cst_20 = arith.constant 1.280000e+02 : f32
    %45 = vector.broadcast %cst_20 : f32 to vector<8x1xf32>
    %46 = arith.divf %44, %45 : vector<8x1xf32>
    %47 = vector.broadcast %46 : vector<8x1xf32> to vector<8x128xf32>
    %48 = arith.subf %40, %47 : vector<8x128xf32>
    %49 = arith.mulf %48, %48 : vector<8x128xf32>
    %cst_21 = arith.constant dense<0.000000e+00> : vector<8xf32>
    %50 = vector.multi_reduction <add>, %49, %cst_21 [1] : vector<8x128xf32> to vector<8xf32>
    %51 = vector.shape_cast %50 : vector<8xf32> to vector<8x1xf32>
    %cst_22 = arith.constant 1.280000e+02 : f32
    %52 = vector.broadcast %cst_22 : f32 to vector<8x1xf32>
    %53 = arith.divf %51, %52 : vector<8x1xf32>
    %cst_23 = arith.constant 9.99999974E-6 : f32
    %54 = vector.broadcast %cst_23 : f32 to vector<8x1xf32>
    %55 = arith.addf %53, %54 : vector<8x1xf32>
    %56 = math.rsqrt %55 : vector<8x1xf32>
    %57 = vector.broadcast %56 : vector<8x1xf32> to vector<8x128xf32>
    %58 = arith.mulf %48, %57 : vector<8x128xf32>
    %59 = vector.broadcast %41 : vector<1x128xf32> to vector<8x128xf32>
    %60 = arith.mulf %58, %59 : vector<8x128xf32>
    %61 = vector.broadcast %42 : vector<1x128xf32> to vector<8x128xf32>
    %62 = arith.addf %60, %61 : vector<8x128xf32>
    %cst_24 = arith.constant 0.000000e+00 : f32
    %63 = vector.broadcast %cst_24 : f32 to vector<8x128xf32>
    %64 = arith.maximumf %62, %63 : vector<8x128xf32>
    %c0_25 = arith.constant 0 : index
    %c0_26 = arith.constant 0 : index
    %c0_27 = arith.constant 0 : index
    %65 = vector.load %arg6[%c0_25, %c0_26, %c0_27] : memref<1x128x2xf32, #tpu.memory_space<vmem>>, vector<1x128x2xf32>
    %66 = vector.shape_cast %65 : vector<1x128x2xf32> to vector<128x2xf32>
    %cst_28 = arith.constant dense<0.000000e+00> : vector<8x2xf32>
    %67 = tpu.matmul %64, %66, %cst_28 {dimension_numbers = #tpu.dot_dimension_numbers<[1], [0], [0], [1], [0, 0, 1, 1], [], []>} : vector<8x128xf32>, vector<128x2xf32>, vector<8x2xf32> -> vector<8x2xf32>
    %68 = vector.extract_strided_slice %1 {offsets = [6, 0], sizes = [1, 2], strides = [1, 1]} : vector<8x128xf32> to vector<1x2xf32>
    %69 = vector.broadcast %68 : vector<1x2xf32> to vector<8x2xf32>
    %70 = arith.addf %67, %69 : vector<8x2xf32>
    %c0_29 = arith.constant 0 : index
    %c0_30 = arith.constant 0 : index
    %c0_31 = arith.constant 0 : index
    %71 = vector.load %arg8[%c0_29, %c0_30, %c0_31] : memref<1x8x2xf32, #tpu.memory_space<vmem>>, vector<1x8x2xf32>
    %72 = vector.shape_cast %71 : vector<1x8x2xf32> to vector<8x2xf32>
    %73 = vector.shape_cast %70 : vector<8x2xf32> to vector<1x8x2xf32>
    tpu.vector_store %arg8[%c0_29, %c0_30, %c0_31], %73 {strides = array<i32>} : memref<1x8x2xf32, #tpu.memory_space<vmem>>, vector<1x8x2xf32>,
    return
  }
  func.func @transform_0(%arg0: i32, %arg1: i32) -> (i32, i32) {
    %c0_i32 = arith.constant 0 : i32
    %c0_i32_0 = arith.constant 0 : i32
    return %arg1, %c0_i32 : i32, i32
  }
  func.func @transform_1(%arg0: i32, %arg1: i32) -> (i32, i32) {
    %c0_i32 = arith.constant 0 : i32
    %c0_i32_0 = arith.constant 0 : i32
    return %arg1, %c0_i32 : i32, i32
  }
  func.func @transform_2(%arg0: i32, %arg1: i32) -> (i32, i32, i32) {
    %c0_i32 = arith.constant 0 : i32
    %c0_i32_0 = arith.constant 0 : i32
    %c0_i32_1 = arith.constant 0 : i32
    return %arg0, %c0_i32, %c0_i32_0 : i32, i32, i32
  }
  func.func @transform_3(%arg0: i32, %arg1: i32) -> (i32, i32, i32) {
    %c0_i32 = arith.constant 0 : i32
    %c0_i32_0 = arith.constant 0 : i32
    %c0_i32_1 = arith.constant 0 : i32
    return %arg0, %c0_i32, %c0_i32_0 : i32, i32, i32
  }
  func.func @transform_4(%arg0: i32, %arg1: i32) -> (i32, i32, i32) {
    %c0_i32 = arith.constant 0 : i32
    %c0_i32_0 = arith.constant 0 : i32
    %c0_i32_1 = arith.constant 0 : i32
    return %arg0, %c0_i32, %c0_i32_0 : i32, i32, i32
  }
  func.func @transform_5(%arg0: i32, %arg1: i32) -> (i32, i32, i32) {
    %c0_i32 = arith.constant 0 : i32
    %c0_i32_0 = arith.constant 0 : i32
    %c0_i32_1 = arith.constant 0 : i32
    return %arg0, %c0_i32, %c0_i32_0 : i32, i32, i32
  }
  func.func @transform_6(%arg0: i32, %arg1: i32) -> (i32, i32, i32) {
    %c0_i32 = arith.constant 0 : i32
    %c0_i32_0 = arith.constant 0 : i32
    return %arg0, %arg1, %c0_i32 : i32, i32, i32
  }
}

</mosaic_0001>

<bundles_post_ra>
// kernel: droq_critic_ensemble_forward.1
= control target key start
LH: loop header
LB: loop body
LE: loop exit
PB: predicated region body
PF: predicated region fallthrough
CT: control target
= control target key end

     0   :  { %11 = vsyncpa [#allocation3], 0  ;;  %s1601_s0 = inlined_call_operand.hbm [shape: f32[8,16], index: 0, kind: input, shape index: {}]   ;;  %s1602_s1 = inlined_call_operand.hbm [shape: f32[8,8], index: 1, kind: input, shape index: {}]   ;;  %s1603_s2 = inlined_call_operand.hbm [shape: f32[2,24,128], index: 2, kind: input, shape index: {}]   ;;  %s1604_s3 = inlined_call_operand.vmem [shape: f32[2,128,128], index: 3, kind: input, shape index: {}]   ;;  %s1605_s4 = inlined_call_operand.vmem [shape: f32[2,128,2], index: 4, kind: input, shape index: {}]   ;;  %s1606_s5 = inlined_call_operand.vmem [shape: f32[2,8,128], index: 5, kind: input, shape index: {}]   ;;  %s1607_s6 = inlined_call_operand.vmem [shape: f32[2,8,2], index: 6, kind: output, shape index: {}]  }
   0x1   :  { %12 = vsyncpa [#allocation5], 0  ;;  %s1311_s21 = smov 0   ;;  %s1313_s22 = smov 0  }
   0x2   :  { %s1315_s23 = smov 0   ;;  %s1317_s24 = smov 0  }
   0x3   :  { %s1319_s25 = smov 0   ;;  %s1321_s26 = smov 0  }
   0x4 LB: > { %s843_s27 = sadd.s32 4294967295, %s1265_s26   ;;  %s89_s28 = sadd.s32 1, %s1253_s23  ;;  %s1265_s26 = sphi %s1321_s26, %s18_s26   ;;  %s1261_s25 = sphi %s1319_s25, %s1626_s25   ;;  %s1257_s24 = sphi %s1317_s24, %s1625_s24   ;;  %s1253_s23 = sphi %s1315_s23, %s1624_s23   ;;  %s1249_s22 = sphi %s1313_s22, %s1623_s22   ;;  %s1245_s21 = sphi %s1311_s21, %s1622_s21  }
   0x5   : > { %p96_p0 = scmp.ne.s32.totalorder %s1253_s23, %s1249_s22  ;;  %p97_p1 = scmp.eq.s32.totalorder %s1265_s26, 0 }
   0x6   : > { %p102_p2 = scmp.ne.s32.totalorder %s1249_s22, %s1245_s21  ;;  %p1347_p3 = scmp.eq.s32.totalorder %s843_s27, 0 }
   0x7   : > { %p98_p4 = por %p97_p1, %p96_p0  ;;  %p845_p5 = scmp.ge.s32.totalorder %s1265_s26, 1 }
   0x8   : > { %s1613_s29 = scalar_select %p1347_p3, 1, 0 }
   0x9   : > { %p1354_p6 = por %p1347_p3, %p102_p2  ;;  %p219_p7 = scmp.lt.s32.totalorder %s1265_s26, 3 }
   0xa   : > { %s1267_s8 = smov [#allocation2]   ;;  %p1058_p10 = scmp.lt.s32.totalorder %s1265_s26, 2 }
   0xb   : > { %s1614_s30 = scalar_select %p1354_p6, 1, 0 }
   0xc   : > { %p1359_p8 = pnand %p845_p5, %p219_p7  ;;  %s234_s9 = sshll.u32 %s1267_s8, 4  ;;  %s235_s9 = int_to_ptr.vmem [resolvable:$true] %s234_s9 }
   0xd   : > { %p1372_p12 = pnand %p1058_p10, %p98_p4  ;;  %s1268_s12 = smov [#allocation4]  }
   0xe   : > { %s1615_s7 = scalar_select %p1359_p8, 1, 0 }
   0xf   : > { %p1045_p9 = pneg %p1359_p8  ;;  %s247_s13 = sshll.u32 %s1268_s12, 4  ;;  %s248_s13 = int_to_ptr.vmem [resolvable:$true] %s247_s13 }
  0x10   : > { %s1617_s11 = scalar_select %p1372_p12, 1, 0 }
  0x11   : > { %p1368_p11 = pnand %p1045_p9, %p1347_p3  ;;  %s1121_s16 = scalar_lea.hbm %s1601_s0, 128 }
  0x12   : > { %p1122_p13 = scmp.ne.s32.totalorder %s1601_s0, %s1121_s16  ;;  %p1128_p4 = scmp.lt.u32.totalorder %s1121_s16, %s1601_s0 }
  0x13   : > { %p1123_p0 = pneg %p1368_p11 }
  0x15   : > { %p1124_p1 = pnand %p1123_p0, %p1122_p13 }
  0x17   : > { %p1125_p2 = pneg %p1124_p1 }
  0x19   : > { %p1130_p5 = pnand %p1128_p4, %p1125_p2 }
  0x1b   : > { %1133 = shalt.err (!%p1130_p5)
}
  0x1c   : > { %s1134_s21 = scalar_lea.vmem %s235_s9, 128  ;;  %p1142_p6 = scmp.lt.s32.totalorder %s235_s9, %s235_s9 }
  0x1d   : > { %p1135_p7 = scmp.ne.s32.totalorder %s235_s9, %s1134_s21  ;;  %p1143_p3 = scmp.lt.s32.totalorder %s1134_s21, %s1134_s21 }
  0x1f   : > { %p1137_p9 = pnand %p1135_p7, %p1123_p0  ;;  %p1144_p8 = por %p1143_p3, %p1142_p6 }
  0x21   : > { %p1138_p10 = pneg %p1137_p9 }
  0x23   : > { %p1145_p12 = pnand %p1144_p8, %p1138_p10 }
  0x25   : > { %1148 = shalt.err (!%p1145_p12)
}
  0x26   : > { %1048 = dma.hbm_to_vmem [thread:$0]  (!%p1368_p11), %s1601_s0, 128, %s235_s9, [#allocation3]  }
  0x27   : > { %s30_s14 = sadd.s32 1, %s1261_s25  ;;  %s1149_s17 = scalar_lea.hbm %s1602_s1, 128 }
  0x28   : > { %p1150_p3 = scmp.ne.s32.totalorder %s1602_s1, %s1149_s17  ;;  %p1156_p12 = scmp.lt.u32.totalorder %s1149_s17, %s1602_s1 }
  0x2a   : > { %p1152_p6 = pnand %p1150_p3, %p1123_p0 }
  0x2c   : > { %p1153_p8 = pneg %p1152_p6 }
  0x2e   : > { %p1158_p13 = pnand %p1156_p12, %p1153_p8 }
  0x30   : > { %1161 = shalt.err (!%p1158_p13)
}
  0x31   : > { %s1162_s9 = scalar_lea.vmem %s248_s13, 128  ;;  %p1170_p5 = scmp.lt.s32.totalorder %s248_s13, %s248_s13 }
  0x32   : > { %p1163_p1 = scmp.ne.s32.totalorder %s248_s13, %s1162_s9  ;;  %p1171_p7 = scmp.lt.s32.totalorder %s1162_s9, %s1162_s9 }
  0x34   : > { %p1165_p2 = pnand %p1163_p1, %p1123_p0  ;;  %p1172_p9 = por %p1171_p7, %p1170_p5 }
  0x36   : > { %p1166_p4 = pneg %p1165_p2 }
  0x38   : > { %p1173_p10 = pnand %p1172_p9, %p1166_p4 }
  0x3a   : > { %1176 = shalt.err (!%p1173_p10)
}
  0x3b   : > { %1051 = dma.hbm_to_vmem [thread:$0]  (!%p1368_p11), %s1602_s1, 128, %s248_s13, [#allocation5]  }
  0x3c   : > { %p32_p3 = scmp.ge.s32.totalorder %s30_s14, 2  ;;  %s258_s15 = sand.u32 1, %s1265_s26  }
  0x3d   : > { %s260_s16 = sand.u32 1, %s1253_s23   ;;  %s1033_s18 = smul.u32 384, %s1261_s25 }
  0x3e   : > { %s1628_s14 = smov (%p32_p3, %s30_s14), 0  ;;  %s1032_s17 = smul.u32 24, %s260_s16 }
  0x3f   : > { %s86_s10 = ssub.s32 %s1261_s25, %s1628_s14  ;;  %s1429_s21 = scalar_lea.hbm %s1603_s2, %s1033_s18 }
  0x40   : > { %p87_p0 = scmp.eq.s32.totalorder %s86_s10, 0  ;;  %s262_s13 = scalar_lea.vmem [#allocation6], %s1032_s17 }
  0x41   : > { %s269_s9 = sshll.u32 %s262_s13, 4  ;;  %s1438_s12 = scalar_lea.sflag [#allocation3], %s258_s15  ;;  %s1436_s9 = int_to_ptr.vmem [resolvable:$true] %s269_s9 }
  0x42   : > { %s1434_s8 = scalar_select %p87_p0, %s1253_s23, %s89_s28  }
  0x43   : > { %s1177_s16 = scalar_lea.hbm %s1429_s21, 384  ;;  %p1618_p6 = scmp.ne.s32.totalorder %s1617_s11, 0 }
  0x44   : > { %p1178_p11 = scmp.ne.s32.totalorder %s1429_s21, %s1177_s16  ;;  %s1182_s17 = scalar_lea.hbm %s1603_s2, 768 }
  0x45   : > { %p1179_p8 = pneg %p1618_p6  ;;  %p1183_p1 = scmp.lt.u32.totalorder %s1429_s21, %s1603_s2 }
  0x46   : > { %p1184_p2 = scmp.lt.u32.totalorder %s1182_s17, %s1177_s16  ;;  %p1186_p5 = scmp.lt.u32.totalorder %s1177_s16, %s1429_s21 }
  0x47   : > { %p1180_p12 = pnand %p1179_p8, %p1178_p11 }
  0x48   : > { %p1185_p4 = por %p1184_p2, %p1183_p1 }
  0x49   : > { %p1181_p13 = pneg %p1180_p12 }
  0x4a   : > { %p1187_p7 = por %p1186_p5, %p1185_p4 }
  0x4c   : > { %p1188_p9 = pnand %p1187_p7, %p1181_p13 }
  0x4e   : > { %1191 = shalt.err (!%p1188_p9)
}
  0x4f   : > { %s1192_s28 = scalar_lea.vmem %s1436_s9, 384  ;;  %s1269_s15 = smov [#allocation6]  }
  0x50   : > { %p1193_p10 = scmp.ne.s32.totalorder %s1436_s9, %s1192_s28  ;;  %s1197_s13 = sshll.u32 %s1269_s15, 4  ;;  %s1198_s13 = int_to_ptr.vmem [resolvable:$false] %s1197_s13 }
  0x51   : > { %s1199_s10 = scalar_lea.vmem %s1198_s13, 768  ;;  %p1200_p11 = scmp.lt.s32.totalorder %s1436_s9, %s1198_s13 }
  0x52   : > { %p1195_p3 = pnand %p1193_p10, %p1179_p8  ;;  %p1201_p12 = scmp.lt.s32.totalorder %s1199_s10, %s1192_s28 }
  0x54   : > { %p1196_p0 = pneg %p1195_p3  ;;  %p1202_p1 = por %p1201_p12, %p1200_p11 }
  0x56   : > { %p1203_p2 = pnand %p1202_p1, %p1196_p0 }
  0x58   : > { %1206 = shalt.err (!%p1203_p2)
}
  0x59   : > { %s1270_s16 = smov 128   ;;  %s1271_s18 = smov 8  }
  0x5a   : > { %1055 = dma.hbm_to_vmem [thread:$0]  (!%p1618_p6), %s1429_s21, 384, %s1436_s9, %s1438_s12, %s1270_s16, %s1270_s16, %s1271_s18  }
  0x5b   : > { %p1619_p8 = scmp.ne.s32.totalorder %s1615_s7, 0 }
  0x5c   : > { %p1620_p13 = scmp.ne.s32.totalorder (!%p1619_p8), %s1613_s29, 0 }
  0x5d   : > { %304 = sbr.rel (%p1619_p8) target bundleno = 1496 (0x5d8), region = 44 }
  0x64   : > { %1232 = dma.done.wait (%p1620_p13), [#allocation3], 128  }
  0x65   : > { %1234 = vsyncadd (%p1620_p13), [#allocation3], 4294967168 }
  0x66   : > { %1236 = dma.done.wait (%p1620_p13), [#allocation5], 128  }
  0x67   : > { %1238 = vsyncadd (%p1620_p13), [#allocation5], 4294967168  ;;  %s314_s11 = sand.u32 1, %s843_s27   ;;  %s316_s21 = sand.u32 1, %s1249_s22  }
  0x68   : > { %s1034_s7 = smul.u32 24, %s316_s21  ;;  %s315_s9 = scalar_lea.sflag [#allocation3], %s314_s11 }
  0x69   : > { %p1621_p6 = scmp.ne.s32.totalorder %s1614_s30, 0 }
  0x6a   : > { %s318_s12 = scalar_lea.vmem [#allocation6], %s1034_s7 }
  0x6b   : > { %1240 = dma.done.wait (%p1621_p6), %s315_s9, 384  }
  0x6c   : > { %1242 = vsyncadd (%p1621_p6), %s315_s9, 4294966912  ;;  %v1272_v0 = vmov 0.0|0.0   ;;  %vm1273_vm0 = vmmov 0   ;;  %v1274_v1 = vmov 0.0   ;;  %v386_v2 = vld [vmem:[#allocation4] sm:$0xff]  ;;  %v394_v4 = vld [vmem:[%s318_s12 + $0x8] sm:$0xff]  ;;  %v396_v10 = vlaneseq }
  0x6d   : > { %981 = vmatprep.subr.bf16.mxu0 %v1272_v0  ;;  %908 = vmatprep.mubr.msk.f32.mxu0 %vm1273_vm0, %v1274_v1  ;;  %v393_v3 = vld [vmem:[%s318_s12] sm:$0xff]  ;;  %s1275_s27 = smov 16   ;;  %v395_v6 = vld [vmem:[%s318_s12 + $0x10] sm:$0xff]  ;;  %vm391_vm1 = vcmask 130048   ;;  %vm400_vm2 = vcmask 195584   ;;  %p363_p4 = scmp.lt.s32.totalorder %s1257_s24, 1 }
  0x6e   : > { %984 = vmatprep.subr.bf16.mxu1 %v1272_v0  ;;  %943 = vmatprep.mubr.msk.f32.mxu1 %vm1273_vm0, %v1274_v1  ;;  %v982_v5 = vpack.c.bf16 %v394_v4, %v393_v3  ;;  %v385_v7 = vld [vmem:[#allocation2] sm:$0xff]  ;;  %v1494_v11 = vshrl.u32 %v396_v10, 7  ;;  %vm699_vm3 = vcmask 15360  }
  0x6f   : > { %388 = vrot.lane.b32.xlu0 %v386_v2, %s1275_s27  ;;  %s1630_s24 = smov (!%p363_p4, %s1257_s24), 1 }
  0x70   : > { %983 = vmatpush3.bf16.msra.mxu0 %v982_v5  ;;  %s857_s29 = sshll.u32 %s1630_s24, 3  ;;  %v398_v12 = vsub.s32 0, %v1494_v11  ;;  %s862_s20 = sshll.u32 %s1630_s24, 7  ;;  %v488_v49 = vsub.s32 1, %v1494_v11  ;;  %v493_v50 = vsub.s32 2, %v1494_v11  ;;  %v515_v58 = vsub.s32 3, %v1494_v11 }
  0x71   : > { %906 = vmatprep.subr.mxu0 %v1274_v1  ;;  %s376_s19 = scalar_lea.vmem %s1606_s5, %s857_s29  ;;  %s1511_s13 = scalar_lea.vmem %s1604_s3, %s862_s20 }
  0x72   : > { %v1502_v13 = vld [vmem:[%s376_s19] sm:$0xff]  ;;  %v498_v19 = vld [vmem:[%s1511_s13 + $0x8] sm:$0xff]  ;;  %v499_v20 = vld [vmem:[%s1511_s13 + $0x10] sm:$0xff]  ;;  %s1547_s18 = scalar_lea.vmem %s1605_s4, %s862_s20  ;;  %s383_s7 = scalar_lea.vmem %s1607_s6, %s857_s29 }
  0x73   : > { %v399_v14 = vrot.slane %v1502_v13, %v398_v12  ;;  %v497_v18 = vld [vmem:[%s1511_s13] sm:$0xff]  ;;  %v500_v22 = vld [vmem:[%s1511_s13 + $0x18] sm:$0xff]  ;;  %v502_v29 = vld [vmem:[%s1511_s13 + $0x28] sm:$0xff]  ;;  %v489_v51 = vrot.slane %v1502_v13, %v488_v49  ;;  %v494_v54 = vrot.slane %v1502_v13, %v493_v50  ;;  %v516_v59 = vrot.slane %v1502_v13, %v515_v58 }
  0x74   : > { %907 = vmatpush3.msra.mxu0 %v395_v6  ;;  %v985_v21 = vpack.c.bf16 %v498_v19, %v497_v18  ;;  %v988_v23 = vpack.c.bf16 %v500_v22, %v499_v20  ;;  %v501_v28 = vld [vmem:[%s1511_s13 + $0x20] sm:$0xff]  ;;  %v503_v31 = vld [vmem:[%s1511_s13 + $0x30] sm:$0xff]  ;;  %v504_v32 = vld [vmem:[%s1511_s13 + $0x38] sm:$0xff] }
  0x75   : > { %1008 = vmatprep.subr.bf16.mxu0 %v1272_v0  ;;  %v991_v30 = vpack.c.bf16 %v502_v29, %v501_v28  ;;  %v994_v33 = vpack.c.bf16 %v504_v32, %v503_v31  ;;  %v505_v34 = vld [vmem:[%s1511_s13 + $0x40] sm:$0xff]  ;;  %v506_v35 = vld [vmem:[%s1511_s13 + $0x48] sm:$0xff]  ;;  %v507_v37 = vld [vmem:[%s1511_s13 + $0x50] sm:$0xff] }
  0x76   : > { %986 = vmatpush3.bf16.msra.mxu1 %v985_v21  ;;  %v997_v36 = vpack.c.bf16 %v506_v35, %v505_v34  ;;  %v508_v38 = vld [vmem:[%s1511_s13 + $0x58] sm:$0xff]  ;;  %v509_v40 = vld [vmem:[%s1511_s13 + $0x60] sm:$0xff]  ;;  %v510_v41 = vld [vmem:[%s1511_s13 + $0x68] sm:$0xff]  ;;  %v605_v34 = vsub.s32 5, %v1494_v11 }
  0x77   : > { %987 = vmatprep.subr.bf16.mxu1 %v1272_v0  ;;  %v1000_v39 = vpack.c.bf16 %v508_v38, %v507_v37  ;;  %v1003_v42 = vpack.c.bf16 %v510_v41, %v509_v40  ;;  %v511_v43 = vld [vmem:[%s1511_s13 + $0x70] sm:$0xff]  ;;  %v512_v44 = vld [vmem:[%s1511_s13 + $0x78] sm:$0xff]  ;;  %v609_v63 = vld [vmem:[%s1547_s18] sm:$0xff] }
  0x78   : > { %v1006_v45 = vpack.c.bf16 %v512_v44, %v511_v43  ;;  %v611_v2 = vld [vmem:[%s1547_s18 + $0x10] sm:$0xff]  ;;  %v612_v4 = vld [vmem:[%s1547_s18 + $0x18] sm:$0xff]  ;;  %v613_v10 = vld [vmem:[%s1547_s18 + $0x20] sm:$0xff]  ;;  %v606_v38 = vrot.slane %v1502_v13, %v605_v34 }
  0x79   : > { %v1012_v5 = vpack.c.bf16 %v612_v4, %v611_v2  ;;  %v614_v12 = vld [vmem:[%s1547_s18 + $0x28] sm:$0xff]  ;;  %v617_v18 = vld [vmem:[%s1547_s18 + $0x40] sm:$0xff]  ;;  %v619_v21 = vld [vmem:[%s1547_s18 + $0x50] sm:$0xff] }
  0x7a   : > { %989 = vmatpush3.bf16.msra.mxu1 %v988_v23  ;;  %v618_v19 = vld [vmem:[%s1547_s18 + $0x48] sm:$0xff]  ;;  %v620_v22 = vld [vmem:[%s1547_s18 + $0x58] sm:$0xff] }
  0x7b   : > { %990 = vmatprep.subr.bf16.mxu1 %v1272_v0  ;;  %v1021_v20 = vpack.c.bf16 %v618_v19, %v617_v18  ;;  %v1024_v23 = vpack.c.bf16 %v620_v22, %v619_v21  ;;  %v624_v28 = vld [vmem:[%s1547_s18 + $0x78] sm:$0xff] }
  0x7e   : > { %992 = vmatpush3.bf16.msra.mxu1 %v991_v30 }
  0x7f   : > { %993 = vmatprep.subr.bf16.mxu1 %v1272_v0 }
  0x82   : > { %995 = vmatpush3.bf16.msra.mxu1 %v994_v33  ;;  %v600_v33 = vsub.s32 4, %v1494_v11 }
  0x83   : > { %996 = vmatprep.subr.bf16.mxu1 %v1272_v0 }
  0x84   : > { %v601_v35 = vrot.slane %v1502_v13, %v600_v33 }
  0x86   : > { %998 = vmatpush3.bf16.msra.mxu1 %v997_v36 }
  0x87   : > { %999 = vmatprep.subr.bf16.mxu1 %v1272_v0 }
  0x8a   : > { %1001 = vmatpush3.bf16.msra.mxu1 %v1000_v39 }
  0x8b   : > { %1002 = vmatprep.subr.bf16.mxu1 %v1272_v0 }
  0x8e   : > { %1004 = vmatpush3.bf16.msra.mxu1 %v1003_v42 }
  0x8f   : > { %1005 = vmatprep.subr.bf16.mxu1 %v1272_v0 }
  0x92   : > { %1007 = vmatpush3.bf16.msra.mxu1 %v1006_v45 }
  0xe1   : > { %v389_v8 = vpop.permute.xlu0 %388 }
  0xe2   : > { %v392_v9 = vsel %vm391_vm1, %v385_v7, %v389_v8 }
  0xe3   : > { %909 = vmatmul.mubr.msk.f32.vlgmr.msra.gmra.mrb[0].mxu0 %vm400_vm2, %v392_v9 }
  0xe4   : > { %978 = vmatprep.mubr.msk.f32.mxu0 %vm1273_vm0, %v1274_v1  ;;  %v610_v1 = vld [vmem:[%s1547_s18 + $0x8] sm:$0xff] }
  0xe5   : > { %v1009_v3 = vpack.c.bf16 %v610_v1, %v609_v63 }
  0xe7   : > { %1010 = vmatpush3.bf16.msra.mxu0 %v1009_v3 }
  0xe8   : > { %1011 = vmatprep.subr.bf16.mxu0 %v1272_v0 }
  0xeb   : > { %1013 = vmatpush3.bf16.msra.mxu0 %v1012_v5 }
  0xec   : > { %1014 = vmatprep.subr.bf16.mxu0 %v1272_v0 }
 0x1b6   : > { %v470_v15 = vpop.f32.mrb[0].mxu0 }
 0x1b7   : > { %v471_v16 = vadd.f32 %v470_v15, %v399_v14  ;;  %v910_v17 = vpop.f32.mrb[1].mxu0  ;;  %v1015_v14 = vpack.c.bf16 %v614_v12, %v613_v10  ;;  %v615_v15 = vld [vmem:[%s1547_s18 + $0x30] sm:$0xff] }
 0x1b9   : > { %474 = vadd.xlane.f32.xlu0 %v471_v16  ;;  %1016 = vmatpush3.bf16.msra.mxu0 %v1015_v14 }
 0x1ba   : > { %1017 = vmatprep.subr.bf16.mxu0 %v1272_v0 }
 0x246   : > { %v475_v24 = vpop.xlane.xlu0 %474 }
 0x247   : > { %v477_v25 = vmul.f32 0.0078125, %v475_v24  ;;  %v621_v24 = vld [vmem:[%s1547_s18 + $0x60] sm:$0xff] }
 0x249   : > { %v478_v26 = vsub.f32 %v471_v16, %v477_v25  ;;  %v616_v16 = vld [vmem:[%s1547_s18 + $0x38] sm:$0xff]  ;;  %v622_v25 = vld [vmem:[%s1547_s18 + $0x68] sm:$0xff] }
 0x24a   : > { %v1018_v17 = vpack.c.bf16 %v616_v16, %v615_v15 }
 0x24b   : > { %v479_v27 = vmul.f32 %v478_v26, %v478_v26 }
 0x24c   : > { %1019 = vmatpush3.bf16.msra.mxu0 %v1018_v17 }
 0x24d   : > { %480 = vadd.xlane.f32.xlu1 %v479_v27  ;;  %1020 = vmatprep.subr.bf16.mxu0 %v1272_v0  ;;  %v623_v27 = vld [vmem:[%s1547_s18 + $0x70] sm:$0xff] }
 0x24e   : > { %v1030_v29 = vpack.c.bf16 %v624_v28, %v623_v27 }
 0x250   : > { %1022 = vmatpush3.bf16.msra.mxu0 %v1021_v20 }
 0x251   : > { %1023 = vmatprep.subr.bf16.mxu0 %v1272_v0 }
 0x254   : > { %1025 = vmatpush3.bf16.msra.mxu0 %v1024_v23 }
 0x255   : > { %1026 = vmatprep.subr.bf16.mxu0 %v1272_v0 }
 0x2da   : > { %v481_v46 = vpop.xlane.xlu1 %480 }
 0x2db   : > { %v482_v47 = vmul.f32 0.0078125, %v481_v46 }
 0x2dd   : > { %v483_v48 = vadd.f32 1e-05, %v482_v47 }
 0x2df   : > { %1117 = vrsqrt.f32 %v483_v48 }
 0x2e9   : > { %v1118_v52 = vpop.eup %1117 }
 0x2ea   : > { %v485_v53 = vmul.f32 %v1118_v52, %v478_v26  ;;  %v1027_v26 = vpack.c.bf16 %v622_v25, %v621_v24 }
 0x2ec   : > { %v490_v55 = vmul.f32 %v489_v51, %v485_v53  ;;  %1028 = vmatpush3.bf16.msra.mxu0 %v1027_v26 }
 0x2ed   : > { %1029 = vmatprep.subr.bf16.mxu0 %v1272_v0  ;;  %v627_v0 = vsub.s32 6, %v1494_v11 }
 0x2ee   : > { %v495_v56 = vadd.f32 %v494_v54, %v490_v55 }
 0x2ef   : > { %v628_v42 = vrot.slane %v1502_v13, %v627_v0 }
 0x2f0   : > { %v496_v57 = vmax.f32 %v495_v56, 0.0  ;;  %1031 = vmatpush3.bf16.msra.mxu0 %v1030_v29 }
 0x2f2   : > { %944 = vmatmul.mubr.f32.vlgmr.msra.gmra.mrb[0].mxu1 %v496_v57 }
 0x3c5   : > { %v583_v60 = vpop.f32.mrb[0].mxu1 }
 0x3c6   : > { %v584_v61 = vadd.f32 %v583_v60, %v516_v59  ;;  %v945_v62 = vpop.f32.mrb[1].mxu1 }
 0x3c8   : > { %587 = vadd.xlane.f32.xlu1 %v584_v61 }
 0x455   : > { %v588_v6 = vpop.xlane.xlu1 %587 }
 0x456   : > { %v589_v7 = vmul.f32 0.0078125, %v588_v6 }
 0x458   : > { %v590_v8 = vsub.f32 %v584_v61, %v589_v7 }
 0x45a   : > { %v591_v9 = vmul.f32 %v590_v8, %v590_v8 }
 0x45c   : > { %592 = vadd.xlane.f32.xlu1 %v591_v9 }
 0x4e9   : > { %v593_v30 = vpop.xlane.xlu1 %592 }
 0x4ea   : > { %v594_v31 = vmul.f32 0.0078125, %v593_v30 }
 0x4ec   : > { %v595_v32 = vadd.f32 1e-05, %v594_v31 }
 0x4ee   : > { %1119 = vrsqrt.f32 %v595_v32 }
 0x4f8   : > { %v1120_v36 = vpop.eup %1119 }
 0x4f9   : > { %v597_v37 = vmul.f32 %v1120_v36, %v590_v8 }
 0x4fb   : > { %v602_v39 = vmul.f32 %v601_v35, %v597_v37 }
 0x4fd   : > { %v607_v40 = vadd.f32 %v606_v38, %v602_v39 }
 0x4ff   : > { %v608_v41 = vmax.f32 %v607_v40, 0.0 }
 0x501   : > { %979 = vmatmul.mubr.f32.vlgmr.msra.gmra.mrb[2].mxu0 %v608_v41 }
 0x5d4   : > { %v695_v43 = vpop.f32.mrb[2].mxu0 }
 0x5d5   : > { %v696_v44 = vadd.f32 %v695_v43, %v628_v42  ;;  %v980_v45 = vpop.f32.mrb[3].mxu0 }
 0x5d7   : > { %700 = vst.msk [vmem:[%s383_s7] sm:$0xff] %vm699_vm3, %v696_v44 }
 0x5d8 PF: > { %s18_s26 = sadd.s32 1, %s1265_s26   ;;  %s1622_s21 = smov %s1249_s22 }
 0x5d9   : > { %p15_p5 = scmp.ge.s32.totalorder %s18_s26, 4   ;;  %s1623_s22 = smov %s1253_s23 }
 0x5da   : > { %s1624_s23 = smov %s1434_s8  ;;  %s1625_s24 = smov %s1261_s25 }
 0x5db   : > { %s1626_s25 = smov %s1628_s14  ;;  %17 = sbr.rel (!%p15_p5) target bundleno = 4 (0x4), region = 102 }
 0x5e2   :  { %726 = vsyncpa [#allocation3], 1 }
 0x5e3   :  { %728 = vsyncpa [#allocation3 + $0x1], 1 }
 0x5e4   :  { %729 = vsyncpa [#allocation5], 1 }

</bundles_post_ra>
